<compile_context>
chip_gen: v6e
topology: v6e:2x2x1
jax: 0.10.0
libtpu: 0.0.40
codegen_flags: <defaults>
</compile_context>

<pallas_src>
import functools

import jax
import jax.numpy as jnp
from jax import lax
from jax.experimental import pallas as pl
from jax.experimental.pallas import tpu as pltpu

_VMEM_LIMIT = 48 * 1024 * 1024   # above 16/32 MiB scoped defaults, below v7x physical


# ----------------------------------------------------------------------------
# Kernel 1: per-graph GCN (merged original+shuffled propagation) + readout +
# factored bilinear discriminator.  Grid over graphs, fully parallel.
# ----------------------------------------------------------------------------
def _dmgi_graph_kernel(fs_ref, adj_ref, w_ref, bw_ref, wb_ref, bb_ref,
                       h12_ref, c_ref, logits_ref, *, hd):
    f32 = jnp.float32
    dn = (((1,), (1,)), ((), ()))          # contract dim-1 of both operands (A @ B^T)

    fs = fs_ref[0]                         # (2N, F)  [feature ; shuf]  (maybe bf16)
    adj = adj_ref[0]                       # (N, N)                      (maybe bf16)
    w = w_ref[0]                           # (F, Hd)                     (maybe bf16)
    bw = bw_ref[0]                         # (1, 2Hd) f32  == [b | b]
    wb = wb_ref[...]                       # (Hd, Hd) f32
    bb = bb_ref[...]                       # (1, 1)   f32
    n = adj.shape[0]

    # Feature transform for original + shuffled in one GEMM (sublane-stacked).
    s = jnp.dot(fs, w, preferred_element_type=f32)                         # (2N, Hd)
    # Lane-stack the two halves so a single adj matmul propagates both views.
    s_wide = jnp.concatenate([s[:n], s[n:]], axis=1).astype(adj.dtype)     # (N, 2Hd)

    # Merged GCN propagation + bias + ReLU:  h12 = [h1 | h2].
    h12 = jnp.maximum(
        jnp.dot(adj, s_wide, preferred_element_type=f32) + bw, 0.0)        # (N, 2Hd)

    # AvgReadout (mean over nodes of h1 = first Hd lanes) + sigmoid.
    m12 = jnp.mean(h12, axis=0, keepdims=True)                             # (1, 2Hd)
    c = jax.nn.sigmoid(m12[:, :hd])                                        # (1, Hd)

    # Factored bilinear:  cw[i] = sum_j Wb[i, j] * c[j]  ( == (Wb @ c^T)^T ).
    cw = lax.dot_general(c, wb, dn, preferred_element_type=f32)            # (1, Hd)
    z = jnp.zeros_like(cw)
    cw2 = jnp.concatenate(
        [jnp.concatenate([cw, z], axis=1),
         jnp.concatenate([z, cw], axis=1)], axis=0)                        # (2, 2Hd)
    # Lane-dense (2, N) logits block: row 0 = h1 . cw, row 1 = h2 . cw.
    sc = lax.dot_general(cw2, h12, dn, preferred_element_type=f32)         # (2, N)

    logits_ref[0] = sc + bb
    h12_ref[0] = h12
    c_ref[0] = c


# ----------------------------------------------------------------------------
# Kernel 2 (epilogue): cross-graph mean -> reg_loss, and cluster soft-assignment q.
# Grid over graphs with a running-sum scratch; last step computes the outputs.
# ----------------------------------------------------------------------------
def _dmgi_epilogue_kernel(h12_ref, hp_ref, clu_ref, loss_ref, qt_ref, sum_ref,
                          *, v, n_graphs, hd):
    g = pl.program_id(0)
    h12 = h12_ref[0]                       # (N, 2Hd) f32

    @pl.when(g == 0)
    def _init():
        sum_ref[...] = h12

    @pl.when(g > 0)
    def _accumulate():
        sum_ref[...] = sum_ref[...] + h12

    @pl.when(g == n_graphs - 1)
    def _finalize():
        f32 = jnp.float32
        dn = (((1,), (1,)), ((), ()))

        hp = hp_ref[...]                   # (N, Hd)   == H.squeeze(0)
        clu = clu_ref[...]                 # (K, Hd)

        mean12 = sum_ref[...] * (1.0 / n_graphs)
        d_pos = hp - mean12[:, :hd]
        d_neg = hp - mean12[:, hd:]
        loss = jnp.sum(d_pos * d_pos) - jnp.sum(d_neg * d_neg)
        loss_ref[...] = jnp.full((1, 1), loss, f32)

        # ||H_n - mu_k||^2 = ||mu_k||^2 + ||H_n||^2 - 2 <mu_k, H_n>, computed
        # directly in (K, N) orientation so the q store is lane-dense.
        hn2 = lax.dot_general(jnp.ones((1, hd), f32), hp * hp, dn,
                              preferred_element_type=f32)                  # (1, N)
        cn2 = jnp.sum(clu * clu, axis=1, keepdims=True)                    # (K, 1)
        cross = lax.dot_general(clu, hp, dn, preferred_element_type=f32)   # (K, N)
        dist2 = jnp.maximum(cn2 + hn2 - 2.0 * cross, 0.0)
        q = 1.0 / (1.0 + dist2 * (1.0 / v))
        p = (v + 1.0) / 2.0
        if p != 1.0:                       # trace-time constant exponent
            q = q ** p
        qt_ref[...] = q / jnp.sum(q, axis=0, keepdims=True)                # (K, N)


# ----------------------------------------------------------------------------
# Wrapper.
# ----------------------------------------------------------------------------
def modeler_forward(params, feature, adj, shuf, v=1.0, matmul_dtype=jnp.float32):
    """Fused DMGI modeler forward.

    matmul_dtype=jnp.bfloat16 pre-casts adj / stacked features / W once in HBM
    (halves adj DMA bytes, MXU bf16 path, f32 accumulation).  Default keeps all
    matmul operands in f32 to match the PyTorch reference exactly.
    """
    G, N, F = feature.shape
    Hd = params["w"].shape[-1]
    K = params["cluster"].shape[0]
    f32 = jnp.float32

    # Pre-stack original + shuffled features once in HBM and widen the bias.
    fs = jnp.concatenate([feature, shuf], axis=1)                     # (G, 2N, F)
    b_wide = jnp.concatenate([params["b"], params["b"]], axis=-1)     # (G, 1, 2Hd)
    w = params["w"]
    adj_in = adj
    if matmul_dtype != jnp.float32:
        fs = fs.astype(matmul_dtype)
        adj_in = adj.astype(matmul_dtype)
        w = w.astype(matmul_dtype)

    per_graph3 = lambda g: (g, 0, 0)
    fixed2 = lambda g: (0, 0)

    # --- main per-graph kernel (graph axis fully parallel) ---
    graph_kernel = functools.partial(_dmgi_graph_kernel, hd=Hd)
    h12, c_all, logits = pl.pallas_call(
        graph_kernel,
        out_shape=(
            jax.ShapeDtypeStruct((G, N, 2 * Hd), f32),   # [h1 | h2] lane-concat
            jax.ShapeDtypeStruct((G, 1, Hd), f32),       # c_all
            jax.ShapeDtypeStruct((G, 2, N), f32),        # [sc1_row ; sc2_row]
        ),
        grid_spec=pltpu.PrefetchScalarGridSpec(
            num_scalar_prefetch=0,
            grid=(G,),
            in_specs=[
                pl.BlockSpec((1, 2 * N, F), per_graph3),   # stacked feature|shuf
                pl.BlockSpec((1, N, N), per_graph3),       # adjacency
                pl.BlockSpec((1, F, Hd), per_graph3),      # per-graph GCN weight
                pl.BlockSpec((1, 1, 2 * Hd), per_graph3),  # per-graph bias [b|b]
                pl.BlockSpec((Hd, Hd), fixed2),            # bilinear weight (shared)
                pl.BlockSpec((1, 1), fixed2),              # bilinear bias (shared)
            ],
            out_specs=(
                pl.BlockSpec((1, N, 2 * Hd), per_graph3),
                pl.BlockSpec((1, 1, Hd), per_graph3),
                pl.BlockSpec((1, 2, N), per_graph3),
            ),
        ),
        compiler_params=pltpu.CompilerParams(
            dimension_semantics=("parallel",),             # no cross-graph scratch
            vmem_limit_bytes=_VMEM_LIMIT,
        ),
    )(fs, adj_in, w, b_wide, params["wb"], params["bb"])

    # --- epilogue kernel: cross-graph mean -> reg_loss, and q ---
    epi_kernel = functools.partial(_dmgi_epilogue_kernel, v=v, n_graphs=G, hd=Hd)
    loss, q_t = pl.pallas_call(
        epi_kernel,
        out_shape=(
            jax.ShapeDtypeStruct((1, 1), f32),             # reg_loss
            jax.ShapeDtypeStruct((K, N), f32),             # q transposed (lane-dense)
        ),
        grid_spec=pltpu.PrefetchScalarGridSpec(
            num_scalar_prefetch=0,
            grid=(G,),
            in_specs=[
                pl.BlockSpec((1, N, 2 * Hd), per_graph3),  # [h1 | h2] per graph
                pl.BlockSpec((N, Hd), fixed2),             # H parameter
                pl.BlockSpec((K, Hd), fixed2),             # cluster centers
            ],
            out_specs=(
                pl.BlockSpec((1, 1), fixed2),
                pl.BlockSpec((K, N), fixed2),
            ),
            scratch_shapes=[pltpu.VMEM((N, 2 * Hd), f32)], # running sum over graphs
        ),
        compiler_params=pltpu.CompilerParams(
            # Running-sum scratch carried across the graph axis -> must stay arbitrary.
            dimension_semantics=("arbitrary",),
            vmem_limit_bytes=_VMEM_LIMIT,
        ),
    )(h12, params["H"], params["cluster"])

    return {
        "logits": logits.reshape(G, 2 * N),   # (G, 2N): [sc1 | sc2] per graph
        "reg_loss": loss[0, 0],               # scalar
        "q": q_t.T,                           # (N, K), matches torch layout
        "h_1_all": h12[:, :, :Hd],            # (G, N, Hd)
        "h_2_all": h12[:, :, Hd:],            # (G, N, Hd)
        "c_all": c_all,                       # (G, 1, Hd)
    }


def init_params(key, G, N, F, Hd, K):
    """Deterministic xavier-style init mirroring the torch module's shapes."""
    k0, k1, k2, k3 = jax.random.split(key, 4)
    xav = lambda k, shape, fi, fo: jax.random.normal(k, shape, jnp.float32) * (2.0 / (fi + fo)) ** 0.5
    return {
        "w": xav(k0, (G, F, Hd), F, Hd),            # per-graph GCN fc weights (no fc bias)
        "b": jnp.zeros((G, 1, Hd), jnp.float32),    # per-graph GCN bias (init 0)
        "wb": xav(k1, (Hd, Hd), Hd, Hd),            # nn.Bilinear weight
        "bb": jnp.zeros((1, 1), jnp.float32),       # nn.Bilinear bias
        "H": xav(k2, (N, Hd), N, Hd),               # self.H (stored squeezed: (N, Hd))
        "cluster": xav(k3, (K, Hd), K, Hd),         # self.cluster_layer
    }


def _reference_forward(params, feature, adj, shuf, v=1.0):
    """Pure-JAX reference with the module's semantics (for validation)."""
    w, b, wb, bb = params["w"], params["b"], params["wb"], params["bb"]
    h1 = jax.nn.relu(jnp.einsum("gnm,gmh->gnh", adj,
                                jnp.einsum("gnf,gfh->gnh", feature, w)) + b)
    h2 = jax.nn.relu(jnp.einsum("gnm,gmh->gnh", adj,
                                jnp.einsum("gnf,gfh->gnh", shuf, w)) + b)
    c = jax.nn.sigmoid(jnp.mean(h1, axis=1, keepdims=True))          # (G, 1, Hd)
    sc1 = jnp.einsum("gnh,hk,gok->gn", h1, wb, c) + bb[0, 0]
    sc2 = jnp.einsum("gnh,hk,gok->gn", h2, wb, c) + bb[0, 0]
    logits = jnp.concatenate([sc1, sc2], axis=1)                     # (G, 2N)
    hp = params["H"]
    h1m, h2m = jnp.mean(h1, axis=0), jnp.mean(h2, axis=0)
    reg = jnp.sum((hp - h1m) ** 2) - jnp.sum((hp - h2m) ** 2)
    clu = params["cluster"]
    d2 = jnp.sum((hp[:, None, :] - clu[None, :, :]) ** 2, axis=2)
    q = 1.0 / (1.0 + d2 / v)
    q = q ** ((v + 1.0) / 2.0)
    q = q / jnp.sum(q, axis=1, keepdims=True)
    return {"logits": logits, "reg_loss": reg, "q": q, "h_1_all": h1, "h_2_all": h2}


if __name__ == "__main__":
    # args: nb_graphs=2, dims=[16,16], nb_nodes=8, hid_units=32, clusters=5,
    #       isMeanOrCat='Mean', isAttn=False, isBias=True, sparse=False
    G, N, F, Hd, K = 2, 8, 16, 32, 5
    key = jax.random.PRNGKey(0)
    kf, ks, ka, kp = jax.random.split(key, 4)

    feature = jax.random.normal(kf, (G, N, F), jnp.float32)
    shuf = jax.random.normal(ks, (G, N, F), jnp.float32)
    # symmetric, row-normalized dense adjacency (sparse=False path)
    a = jax.random.uniform(ka, (G, N, N), jnp.float32)
    a = 0.5 * (a + jnp.swapaxes(a, 1, 2)) + jnp.eye(N)[None]
    adj = a / jnp.sum(a, axis=2, keepdims=True)

    params = init_params(kp, G, N, F, Hd, K)

    out = modeler_forward(params, feature, adj, shuf, v=1.0)
    jax.block_until_ready(out)

    # shape checks
    assert out["logits"].shape == (G, 2 * N)
    assert out["q"].shape == (N, K)
    assert out["reg_loss"].shape == ()
    assert out["h_1_all"].shape == (G, N, Hd)
    assert out["h_2_all"].shape == (G, N, Hd)
    assert out["c_all"].shape == (G, 1, Hd)

    # numerics vs. a pure-JAX reference (loose tolerances: f32 MXU accumulation order)
    ref = _reference_forward(params, feature, adj, shuf, v=1.0)
    assert jnp.allclose(out["h_1_all"], ref["h_1_all"], atol=1e-2, rtol=1e-2)
    assert jnp.allclose(out["h_2_all"], ref["h_2_all"], atol=1e-2, rtol=1e-2)
    assert jnp.allclose(out["logits"], ref["logits"], atol=1e-2, rtol=1e-2)
    assert jnp.allclose(out["q"], ref["q"], atol=1e-2, rtol=1e-2)
    assert jnp.allclose(out["reg_loss"], ref["reg_loss"], atol=5e-2, rtol=1e-2)

    # bf16 fast path: exercise lowering, check shapes / finiteness only.
    out_bf16 = modeler_forward(params, feature, adj, shuf, v=1.0,
                               matmul_dtype=jnp.bfloat16)
    jax.block_until_ready(out_bf16)
    assert out_bf16["logits"].shape == (G, 2 * N)
    assert bool(jnp.all(jnp.isfinite(out_bf16["logits"])))
    assert bool(jnp.all(jnp.isfinite(out_bf16["q"])))

    print("KERNEL_OK")
</pallas_src>

<mosaic_0001>
module attributes {stable_mosaic.version = 11 : i64} {
  func.func @_dmgi_graph_kernel(%arg0: i32, %arg1: memref<1x16x16xf32, #tpu.memory_space<vmem>>, %arg2: memref<1x8x8xf32, #tpu.memory_space<vmem>>, %arg3: memref<1x16x32xf32, #tpu.memory_space<vmem>>, %arg4: memref<1x1x64xf32, #tpu.memory_space<vmem>>, %arg5: memref<32x32xf32, #tpu.memory_space<vmem>>, %arg6: memref<1x1xf32, #tpu.memory_space<vmem>>, %arg7: memref<1x8x64xf32, #tpu.memory_space<vmem>>, %arg8: memref<1x1x32xf32, #tpu.memory_space<vmem>>, %arg9: memref<1x2x8xf32, #tpu.memory_space<vmem>>) attributes {dimension_semantics = [#tpu.dimension_semantics<parallel>], iteration_bounds = array<i64: 2>, scalar_prefetch = 0 : i64, scratch_operands = 0 : i64, tpu.core_type = #tpu.core_type<tc>, window_params = [{transform_indices = @transform_0, window_bounds = array<i64: 1, 16, 16>}, {transform_indices = @transform_1, window_bounds = array<i64: 1, 8, 8>}, {transform_indices = @transform_2, window_bounds = array<i64: 1, 16, 32>}, {transform_indices = @transform_3, window_bounds = array<i64: 1, 1, 64>}, {pipeline_mode = #tpu.pipeline_mode<synchronous>, transform_indices = @transform_4, window_bounds = array<i64: 32, 32>}, {pipeline_mode = #tpu.pipeline_mode<synchronous>, transform_indices = @transform_5, window_bounds = array<i64: 1, 1>}, {transform_indices = @transform_6, window_bounds = array<i64: 1, 8, 64>}, {transform_indices = @transform_7, window_bounds = array<i64: 1, 1, 32>}, {transform_indices = @transform_8, window_bounds = array<i64: 1, 2, 8>}]} {
    %c0 = arith.constant 0 : index
    %c0_0 = arith.constant 0 : index
    %c0_1 = arith.constant 0 : index
    %0 = vector.load %arg1[%c0, %c0_0, %c0_1] : memref<1x16x16xf32, #tpu.memory_space<vmem>>, vector<1x16x16xf32>
    %1 = vector.shape_cast %0 : vector<1x16x16xf32> to vector<16x16xf32>
    %c0_2 = arith.constant 0 : index
    %c0_3 = arith.constant 0 : index
    %c0_4 = arith.constant 0 : index
    %2 = vector.load %arg2[%c0_2, %c0_3, %c0_4] : memref<1x8x8xf32, #tpu.memory_space<vmem>>, vector<1x8x8xf32>
    %3 = vector.shape_cast %2 : vector<1x8x8xf32> to vector<8x8xf32>
    %c0_5 = arith.constant 0 : index
    %c0_6 = arith.constant 0 : index
    %c0_7 = arith.constant 0 : index
    %4 = vector.load %arg3[%c0_5, %c0_6, %c0_7] : memref<1x16x32xf32, #tpu.memory_space<vmem>>, vector<1x16x32xf32>
    %5 = vector.shape_cast %4 : vector<1x16x32xf32> to vector<16x32xf32>
    %c0_8 = arith.constant 0 : index
    %c0_9 = arith.constant 0 : index
    %c0_10 = arith.constant 0 : index
    %6 = vector.load %arg4[%c0_8, %c0_9, %c0_10] : memref<1x1x64xf32, #tpu.memory_space<vmem>>, vector<1x1x64xf32>
    %7 = vector.shape_cast %6 : vector<1x1x64xf32> to vector<1x64xf32>
    %c0_11 = arith.constant 0 : index
    %c0_12 = arith.constant 0 : index
    %8 = vector.load %arg5[%c0_11, %c0_12] : memref<32x32xf32, #tpu.memory_space<vmem>>, vector<32x32xf32>
    %c0_13 = arith.constant 0 : index
    %c0_14 = arith.constant 0 : index
    %9 = vector.load %arg6[%c0_13, %c0_14] : memref<1x1xf32, #tpu.memory_space<vmem>>, vector<1x1xf32>
    %cst = arith.constant dense<0.000000e+00> : vector<16x32xf32>
    %10 = tpu.matmul %1, %5, %cst {dimension_numbers = #tpu.dot_dimension_numbers<[1], [0], [0], [1], [0, 0, 1, 1], [], []>} : vector<16x16xf32>, vector<16x32xf32>, vector<16x32xf32> -> vector<16x32xf32>
    %11 = vector.extract_strided_slice %10 {offsets = [0, 0], sizes = [8, 32], strides = [1, 1]} : vector<16x32xf32> to vector<8x32xf32>
    %12 = vector.extract_strided_slice %10 {offsets = [8, 0], sizes = [8, 32], strides = [1, 1]} : vector<16x32xf32> to vector<8x32xf32>
    %13 = tpu.concatenate %11, %12 in 1 : vector<8x32xf32>, vector<8x32xf32> -> vector<8x64xf32>
    %cst_15 = arith.constant dense<0.000000e+00> : vector<8x64xf32>
    %14 = tpu.matmul %3, %13, %cst_15 {dimension_numbers = #tpu.dot_dimension_numbers<[1], [0], [0], [1], [0, 0, 1, 1], [], []>} : vector<8x8xf32>, vector<8x64xf32>, vector<8x64xf32> -> vector<8x64xf32>
    %15 = vector.broadcast %7 : vector<1x64xf32> to vector<8x64xf32>
    %16 = arith.addf %14, %15 : vector<8x64xf32>
    %cst_16 = arith.constant 0.000000e+00 : f32
    %17 = vector.broadcast %cst_16 : f32 to vector<8x64xf32>
    %18 = arith.maximumf %16, %17 : vector<8x64xf32>
    %cst_17 = arith.constant dense<0.000000e+00> : vector<64xf32>
    %19 = vector.multi_reduction <add>, %18, %cst_17 [0] : vector<8x64xf32> to vector<64xf32>
    %20 = vector.shape_cast %19 : vector<64xf32> to vector<1x64xf32>
    %cst_18 = arith.constant 8.000000e+00 : f32
    %21 = vector.broadcast %cst_18 : f32 to vector<1x64xf32>
    %22 = arith.divf %20, %21 : vector<1x64xf32>
    %23 = vector.extract_strided_slice %22 {offsets = [0, 0], sizes = [1, 32], strides = [1, 1]} : vector<1x64xf32> to vector<1x32xf32>
    %24 = arith.negf %23 : vector<1x32xf32>
    %25 = math.exp %24 : vector<1x32xf32>
    %cst_19 = arith.constant 1.000000e+00 : f32
    %26 = vector.broadcast %cst_19 : f32 to vector<1x32xf32>
    %27 = arith.addf %26, %25 : vector<1x32xf32>
    %28 = arith.divf %26, %27 : vector<1x32xf32>
    %cst_20 = arith.constant dense<0.000000e+00> : vector<1x32xf32>
    %29 = tpu.matmul %28, %8, %cst_20 {dimension_numbers = #tpu.dot_dimension_numbers<[1], [1], [0], [0], [0, 0, 1, 0], [], []>} : vector<1x32xf32>, vector<32x32xf32>, vector<1x32xf32> -> vector<1x32xf32>
    %cst_21 = arith.constant 0.000000e+00 : f32
    %30 = vector.broadcast %cst_21 : f32 to vector<1x32xf32>
    %31 = tpu.concatenate %29, %30 in 1 : vector<1x32xf32>, vector<1x32xf32> -> vector<1x64xf32>
    %32 = tpu.concatenate %30, %29 in 1 : vector<1x32xf32>, vector<1x32xf32> -> vector<1x64xf32>
    %33 = tpu.concatenate %31, %32 in 0 : vector<1x64xf32>, vector<1x64xf32> -> vector<2x64xf32>
    %cst_22 = arith.constant dense<0.000000e+00> : vector<2x8xf32>
    %34 = tpu.matmul %33, %18, %cst_22 {dimension_numbers = #tpu.dot_dimension_numbers<[1], [1], [0], [0], [0, 0, 1, 0], [], []>} : vector<2x64xf32>, vector<8x64xf32>, vector<2x8xf32> -> vector<2x8xf32>
    %35 = vector.broadcast %9 : vector<1x1xf32> to vector<2x8xf32>
    %36 = arith.addf %34, %35 : vector<2x8xf32>
    %c0_23 = arith.constant 0 : index
    %c0_24 = arith.constant 0 : index
    %c0_25 = arith.constant 0 : index
    %37 = vector.load %arg9[%c0_23, %c0_24, %c0_25] : memref<1x2x8xf32, #tpu.memory_space<vmem>>, vector<1x2x8xf32>
    %38 = vector.shape_cast %37 : vector<1x2x8xf32> to vector<2x8xf32>
    %39 = vector.shape_cast %36 : vector<2x8xf32> to vector<1x2x8xf32>
    tpu.vector_store %arg9[%c0_23, %c0_24, %c0_25], %39 {strides = array<i32>} : memref<1x2x8xf32, #tpu.memory_space<vmem>>, vector<1x2x8xf32>,
    %c0_26 = arith.constant 0 : index
    %c0_27 = arith.constant 0 : index
    %c0_28 = arith.constant 0 : index
    %40 = vector.load %arg7[%c0_26, %c0_27, %c0_28] : memref<1x8x64xf32, #tpu.memory_space<vmem>>, vector<1x8x64xf32>
    %41 = vector.shape_cast %40 : vector<1x8x64xf32> to vector<8x64xf32>
    %42 = vector.shape_cast %18 : vector<8x64xf32> to vector<1x8x64xf32>
    tpu.vector_store %arg7[%c0_26, %c0_27, %c0_28], %42 {strides = array<i32>} : memref<1x8x64xf32, #tpu.memory_space<vmem>>, vector<1x8x64xf32>,
    %c0_29 = arith.constant 0 : index
    %c0_30 = arith.constant 0 : index
    %c0_31 = arith.constant 0 : index
    %43 = vector.load %arg8[%c0_29, %c0_30, %c0_31] : memref<1x1x32xf32, #tpu.memory_space<vmem>>, vector<1x1x32xf32>
    %44 = vector.shape_cast %43 : vector<1x1x32xf32> to vector<1x32xf32>
    %45 = vector.shape_cast %28 : vector<1x32xf32> to vector<1x1x32xf32>
    tpu.vector_store %arg8[%c0_29, %c0_30, %c0_31], %45 {strides = array<i32>} : memref<1x1x32xf32, #tpu.memory_space<vmem>>, vector<1x1x32xf32>,
    return
  }
  func.func @transform_0(%arg0: i32) -> (i32, i32, i32) {
    %c0_i32 = arith.constant 0 : i32
    %c0_i32_0 = arith.constant 0 : i32
    %c0_i32_1 = arith.constant 0 : i32
    return %arg0, %c0_i32, %c0_i32_0 : i32, i32, i32
  }
  func.func @transform_1(%arg0: i32) -> (i32, i32, i32) {
    %c0_i32 = arith.constant 0 : i32
    %c0_i32_0 = arith.constant 0 : i32
    %c0_i32_1 = arith.constant 0 : i32
    return %arg0, %c0_i32, %c0_i32_0 : i32, i32, i32
  }
  func.func @transform_2(%arg0: i32) -> (i32, i32, i32) {
    %c0_i32 = arith.constant 0 : i32
    %c0_i32_0 = arith.constant 0 : i32
    %c0_i32_1 = arith.constant 0 : i32
    return %arg0, %c0_i32, %c0_i32_0 : i32, i32, i32
  }
  func.func @transform_3(%arg0: i32) -> (i32, i32, i32) {
    %c0_i32 = arith.constant 0 : i32
    %c0_i32_0 = arith.constant 0 : i32
    %c0_i32_1 = arith.constant 0 : i32
    return %arg0, %c0_i32, %c0_i32_0 : i32, i32, i32
  }
  func.func @transform_4(%arg0: i32) -> (i32, i32) {
    %c0_i32 = arith.constant 0 : i32
    %c0_i32_0 = arith.constant 0 : i32
    %c0_i32_1 = arith.constant 0 : i32
    return %c0_i32, %c0_i32_0 : i32, i32
  }
  func.func @transform_5(%arg0: i32) -> (i32, i32) {
    %c0_i32 = arith.constant 0 : i32
    %c0_i32_0 = arith.constant 0 : i32
    %c0_i32_1 = arith.constant 0 : i32
    return %c0_i32, %c0_i32_0 : i32, i32
  }
  func.func @transform_6(%arg0: i32) -> (i32, i32, i32) {
    %c0_i32 = arith.constant 0 : i32
    %c0_i32_0 = arith.constant 0 : i32
    %c0_i32_1 = arith.constant 0 : i32
    return %arg0, %c0_i32, %c0_i32_0 : i32, i32, i32
  }
  func.func @transform_7(%arg0: i32) -> (i32, i32, i32) {
    %c0_i32 = arith.constant 0 : i32
    %c0_i32_0 = arith.constant 0 : i32
    %c0_i32_1 = arith.constant 0 : i32
    return %arg0, %c0_i32, %c0_i32_0 : i32, i32, i32
  }
  func.func @transform_8(%arg0: i32) -> (i32, i32, i32) {
    %c0_i32 = arith.constant 0 : i32
    %c0_i32_0 = arith.constant 0 : i32
    %c0_i32_1 = arith.constant 0 : i32
    return %arg0, %c0_i32, %c0_i32_0 : i32, i32, i32
  }
}

</mosaic_0001>

<bundles_post_ra>
// kernel: tpu_custom_call.1
= control target key start
LH: loop header
LB: loop body
LE: loop exit
PB: predicated region body
PF: predicated region fallthrough
CT: control target
= control target key end

     0   :  { %s1861_s0 = inlined_call_operand.hbm [shape: f32[2,16,16], index: 0, kind: input, shape index: {}]   ;;  %s1862_s1 = inlined_call_operand.hbm [shape: f32[2,8,8], index: 1, kind: input, shape index: {}]   ;;  %s1863_s2 = inlined_call_operand.hbm [shape: f32[2,16,32], index: 2, kind: input, shape index: {}]   ;;  %s1864_s3 = inlined_call_operand.vmem [shape: f32[2,1,64], index: 3, kind: input, shape index: {}]   ;;  %s1865_s4 = inlined_call_operand.hbm [shape: f32[32,32], index: 4, kind: input, shape index: {}]   ;;  %s1866_s5 = inlined_call_operand.<no memory space> [shape: f32[1,1], index: 5, kind: input, shape index: {}]   ;;  %s1867_s6 = inlined_call_operand.hbm [shape: f32[2,8,64], index: 6, kind: output, shape index: {0}]   ;;  %s1868_s7 = inlined_call_operand.hbm [shape: f32[2,1,32], index: 7, kind: output, shape index: {1}]   ;;  %s1869_s8 = inlined_call_operand.hbm [shape: f32[2,2,8], index: 8, kind: output, shape index: {2}]  }
   0x1   :  { %1886 = sst [smem:[#allocation26_spill]] %s1862_s1  ;;  %v14_v0 = vstv %s1866_s5 }
   0x2   :  { %1887 = sst [smem:[#allocation27_spill]] %s1867_s6  ;;  %15 = vst [vmem:[#allocation2] sm:$0x1] %v14_v0 }
   0x3   :  { %1888 = sst [smem:[#allocation28_spill]] %s1869_s8 }
   0x4   :  { %16 = vsyncpa [#allocation4], 0 }
   0x5   :  { %18 = vsyncpa [#allocation4 + $0x1], 0 }
   0x6   :  { %19 = vsyncpa [#allocation7], 0 }
   0x7   :  { %21 = vsyncpa [#allocation7 + $0x1], 0 }
   0x8   :  { %22 = vsyncpa [#allocation10], 0 }
   0x9   :  { %23 = vsyncpa [#allocation5], 0 }
   0xa   :  { %25 = vsyncpa [#allocation5 + $0x1], 0 }
   0xb   :  { %26 = vsyncpa [#allocation13], 0 }
   0xc   :  { %28 = vsyncpa [#allocation13 + $0x1], 0  ;;  %s1538_s29 = smov 0   ;;  %s1540_s30 = smov 0  }
   0xd   :  { %s1542_s9 = smov 0   ;;  %s1544_s10 = smov 0  }
   0xe LB: > { %1889 = sst [smem:[#allocation20_spill]] %s1463_s29  ;;  %s1559_s5 = sadd.s32 1, %s1475_s10   ;;  %s1475_s10 = sphi %s1544_s10, %s1920_s10   ;;  %s1471_s9 = sphi %s1542_s9, %s1922_s9   ;;  %s1467_s30 = sphi %s1540_s30, %s1924_s30   ;;  %s1463_s29 = sphi %s1538_s29, %s1923_s29  }
   0xf   : > { %1890 = sst [smem:[#allocation21_spill]] %s1471_s9  ;;  %s41_s11 = sadd.s32 1, %s1471_s9 }
  0x10   : > { %1891 = sst [smem:[#allocation22_spill]] %s1475_s10  ;;  %s38_s12 = ssub.s32 %s1475_s10, %s1559_s5 }
  0x11   : > { %1892 = sst [smem:[#allocation23_spill]] %s1559_s5  ;;  %p1870_p0 = scmp.ne.s32.totalorder %s1471_s9, %s1467_s30 }
  0x12   : > { %p39_p1 = scmp.eq.s32.totalorder %s38_s12, 0  ;;  %p49_p2 = scmp.eq.s32.totalorder %s1475_s10, 0 }
  0x13   : > { %p1189_p4 = scmp.lt.s32.totalorder %s1475_s10, 2  ;;  %s1576_s14 = sand.u32 1, %s1471_s9  }
  0x14   : > { %s1570_s13 = scalar_select %p39_p1, %s1471_s9, %s41_s11  }
  0x15   : > { %p50_p5 = por %p49_p2, %p1870_p0  ;;  %s1872_s15 = sshll.u32 %s1576_s14, 4 }
  0x16   : > { %1893 = sst [smem:[#allocation24_spill]] %s1570_s13  ;;  %s313_s16 = sand.u32 1, %s1475_s10  }
  0x17   : > { %p1580_p6 = pnand %p1189_p4, %p50_p5  ;;  %s1073_s18 = sshll.u32 %s1576_s14, 3 }
  0x18   : > { %s1074_s19 = sshll.u32 %s1475_s10, 7  ;;  %s1895_s1 = sld [smem:[#allocation26_spill]] }
  0x19   : > { %s317_s23 = scalar_lea.vmem [#allocation6], %s1073_s18  ;;  %s1591_s25 = scalar_lea.sflag [#allocation7], %s313_s16 }
  0x1a   : > { %s324_s24 = sshll.u32 %s317_s23, 4  ;;  %p1597_p8 = pneg %p1580_p6  ;;  %s325_s24 = int_to_ptr.vmem [resolvable:$true] %s324_s24 }
  0x1e   : > { %s1589_s22 = scalar_lea.hbm %s1895_s1, %s1074_s19  ;;  %s1242_s12 = scalar_lea.hbm %s1895_s1, 256 }
  0x1f   : > { %s1237_s26 = scalar_lea.hbm %s1589_s22, 128  ;;  %p1243_p11 = scmp.lt.s32.totalorder %s1589_s22, %s1895_s1 }
  0x20   : > { %p1238_p7 = scmp.ne.s32.totalorder %s1589_s22, %s1237_s26  ;;  %p1244_p12 = scmp.lt.s32.totalorder %s1242_s12, %s1237_s26 }
  0x22   : > { %p1240_p9 = pnand %p1597_p8, %p1238_p7  ;;  %p1245_p13 = por %p1244_p12, %p1243_p11 }
  0x24   : > { %p1241_p10 = pneg %p1240_p9 }
  0x26   : > { %p1246_p1 = pnand %p1245_p13, %p1241_p10 }
  0x28   : > { %1249 = shalt.err (!%p1246_p1)
}
  0x29   : > { %s1250_s16 = scalar_lea.vmem %s325_s24, 128  ;;  %s1477_s20 = smov [#allocation6]  }
  0x2a   : > { %p1251_p2 = scmp.ne.s32.totalorder %s325_s24, %s1250_s16  ;;  %s1255_s21 = sshll.u32 %s1477_s20, 4  ;;  %s1256_s21 = int_to_ptr.vmem [resolvable:$false] %s1255_s21 }
  0x2b   : > { %s1257_s23 = scalar_lea.vmem %s1256_s21, 256  ;;  %p1258_p7 = scmp.lt.s32.totalorder %s325_s24, %s1256_s21 }
  0x2c   : > { %p1253_p4 = pnand %p1251_p2, %p1597_p8  ;;  %p1259_p9 = scmp.lt.s32.totalorder %s1257_s23, %s1250_s16 }
  0x2e   : > { %p1254_p5 = pneg %p1253_p4  ;;  %p1260_p3 = por %p1259_p9, %p1258_p7 }
  0x30   : > { %p1261_p0 = pnand %p1260_p3, %p1254_p5 }
  0x32   : > { %1264 = shalt.err (!%p1261_p0)
}
  0x33   : > { %1174 = dma.hbm_to_vmem [thread:$0]  (!%p1580_p6), %s1589_s22, 128, %s325_s24, %s1591_s25  }
  0x34   : > { %s335_s26 = scalar_lea.vmem [#allocation8], %s1872_s15  ;;  %s1621_s11 = sadd.s32 4294967295, %s1475_s10  }
  0x35   : > { %s342_s28 = sshll.u32 %s335_s26, 4  ;;  %s1871_s12 = sadd.s32 4294967294, %s1475_s10   ;;  %s1618_s28 = int_to_ptr.vmem [resolvable:$true] %s342_s28 }
  0x36   : > { %p54_p0 = scmp.ne.s32.totalorder %s1467_s30, %s1463_s29  ;;  %p1879_p3 = scmp.eq.s32.totalorder %s1621_s11, 0 }
  0x37   : > { %p198_p10 = scmp.eq.s32.totalorder %s1621_s11, 1  ;;  %p204_p11 = scmp.eq.s32.totalorder %s1871_s12, 1 }
  0x38   : > { %p1632_p12 = por %p1879_p3, %p54_p0  ;;  %p1067_p13 = scmp.ge.s32.totalorder %s1475_s10, 1 }
  0x39   : > { %p1898_p1 = scmp.ne.s32.totalorder %s1471_s9, %s1467_s30  ;;  %p1644_p4 = por %p204_p11, %p54_p0 }
  0x3a   : > { %s1897_s22 = scalar_select %p1632_p12, 1, 0 }
  0x3b   : > { %p1640_p2 = por %p198_p10, %p1898_p1  ;;  %p263_p5 = scmp.lt.s32.totalorder %s1475_s10, 3 }
  0x3c   : > { %s1900_s18 = scalar_select %p1644_p4, 1, 0 }
  0x3d   : > { %s1899_s24 = scalar_select %p1640_p2, 1, 0 }
  0x3e   : > { %1901 = sst [smem:[#allocation25_spill]] %s1900_s18  ;;  %p1649_p7 = pnand %p1067_p13, %p263_p5 }
  0x3f   : > { %s1478_s16 = smov [#allocation9]   ;;  %s1105_s21 = sshll.u32 %s1475_s10, 8 }
  0x40   : > { %s1902_s19 = scalar_select %p1649_p7, 1, 0 }
  0x41   : > { %s275_s20 = sshll.u32 %s1478_s16, 4  ;;  %p1164_p9 = pneg %p1649_p7  ;;  %s276_s20 = int_to_ptr.vmem [resolvable:$true] %s275_s20 }
  0x42   : > { %s1665_s15 = scalar_lea.hbm %s1861_s0, %s1105_s21  ;;  %s1904_s1 = sshll.u32 %s1576_s14, 4 }
  0x43   : > { %p1658_p10 = pnand %p1164_p9, %p1879_p3  ;;  %s296_s13 = scalar_lea.vmem [#allocation3], %s1904_s1 }
  0x44   : > { %s303_s9 = sshll.u32 %s296_s13, 4  ;;  %s1672_s18 = scalar_lea.hbm %s1863_s2, %s1105_s21  ;;  %s1674_s9 = int_to_ptr.vmem [resolvable:$true] %s303_s9 }
  0x45   : > { %p1267_p0 = pneg %p1658_p10  ;;  %s1276_s10 = scalar_lea.vmem %s276_s20, 512 }
  0x46   : > { %p1277_p11 = scmp.ne.s32.totalorder %s276_s20, %s1276_s10  ;;  %p1284_p5 = scmp.lt.s32.totalorder %s276_s20, %s276_s20 }
  0x47   : > { %p1285_p9 = scmp.lt.s32.totalorder %s1276_s10, %s1276_s10 }
  0x48   : > { %p1279_p13 = pnand %p1277_p11, %p1267_p0 }
  0x49   : > { %p1286_p3 = por %p1285_p9, %p1284_p5 }
  0x4a   : > { %p1280_p1 = pneg %p1279_p13 }
  0x4c   : > { %p1287_p4 = pnand %p1286_p3, %p1280_p1 }
  0x4e   : > { %1290 = shalt.err (!%p1287_p4)
}
  0x4f   : > { %s1479_s1 = smov 128   ;;  %s1480_s5 = smov 8  }
  0x50   : > { %1167 = dma.hbm_to_vmem [thread:$0]  (!%p1658_p10), %s1865_s4, 512, %s276_s20, [#allocation10], %s1479_s1, %s1479_s1, %s1480_s5  }
  0x51   : > { %s293_s10 = scalar_lea.sflag [#allocation4], %s1576_s14  ;;  %s1291_s21 = scalar_lea.hbm %s1665_s15, 256 }
  0x52   : > { %p1292_p3 = scmp.ne.s32.totalorder %s1665_s15, %s1291_s21  ;;  %s1296_s29 = scalar_lea.hbm %s1861_s0, 512 }
  0x53   : > { %p1297_p11 = scmp.lt.s32.totalorder %s1665_s15, %s1861_s0  ;;  %p1298_p13 = scmp.lt.s32.totalorder %s1296_s29, %s1291_s21 }
  0x54   : > { %p1294_p4 = pnand %p1292_p3, %p1597_p8 }
  0x55   : > { %p1299_p1 = por %p1298_p13, %p1297_p11 }
  0x56   : > { %p1295_p0 = pneg %p1294_p4 }
  0x58   : > { %p1300_p5 = pnand %p1299_p1, %p1295_p0 }
  0x5a   : > { %1303 = shalt.err (!%p1300_p5)
}
  0x5b   : > { %s1304_s14 = scalar_lea.vmem %s1674_s9, 256  ;;  %s1481_s20 = smov [#allocation3]  }
  0x5c   : > { %p1305_p10 = scmp.ne.s32.totalorder %s1674_s9, %s1304_s14  ;;  %s1309_s23 = sshll.u32 %s1481_s20, 4  ;;  %s1310_s23 = int_to_ptr.vmem [resolvable:$false] %s1309_s23 }
  0x5d   : > { %s1311_s13 = scalar_lea.vmem %s1310_s23, 512  ;;  %p1312_p4 = scmp.lt.s32.totalorder %s1674_s9, %s1310_s23 }
  0x5e   : > { %p1307_p9 = pnand %p1305_p10, %p1597_p8  ;;  %p1313_p2 = scmp.lt.s32.totalorder %s1311_s13, %s1304_s14 }
  0x60   : > { %p1308_p3 = pneg %p1307_p9  ;;  %p1314_p12 = por %p1313_p2, %p1312_p4 }
  0x62   : > { %p1315_p7 = pnand %p1314_p12, %p1308_p3 }
  0x64   : > { %1318 = shalt.err (!%p1315_p7)
}
  0x65   : > { %1171 = dma.hbm_to_vmem [thread:$0]  (!%p1580_p6), %s1665_s15, 256, %s1674_s9, %s293_s10, %s1479_s1, %s1479_s1, %s1480_s5  }
  0x66   : > { %s1319_s6 = scalar_lea.hbm %s1672_s18, 256  ;;  %s1324_s12 = scalar_lea.hbm %s1863_s2, 512 }
  0x67   : > { %p1320_p0 = scmp.ne.s32.totalorder %s1672_s18, %s1319_s6  ;;  %p1325_p12 = scmp.lt.s32.totalorder %s1672_s18, %s1863_s2 }
  0x68   : > { %p1326_p2 = scmp.lt.s32.totalorder %s1324_s12, %s1319_s6 }
  0x69   : > { %p1322_p11 = pnand %p1320_p0, %p1597_p8 }
  0x6a   : > { %p1327_p7 = por %p1326_p2, %p1325_p12 }
  0x6b   : > { %p1323_p13 = pneg %p1322_p11 }
  0x6d   : > { %p1328_p1 = pnand %p1327_p7, %p1323_p13 }
  0x6f   : > { %1331 = shalt.err (!%p1328_p1)
}
  0x70   : > { %s1332_s9 = scalar_lea.vmem %s1618_s28, 256  ;;  %s1482_s15 = smov [#allocation8]  }
  0x71   : > { %p1333_p5 = scmp.ne.s32.totalorder %s1618_s28, %s1332_s9  ;;  %s1337_s10 = sshll.u32 %s1482_s15, 4  ;;  %s1338_s10 = int_to_ptr.vmem [resolvable:$false] %s1337_s10 }
  0x72   : > { %s1339_s16 = scalar_lea.vmem %s1338_s10, 512  ;;  %p1340_p3 = scmp.lt.s32.totalorder %s1618_s28, %s1338_s10 }
  0x73   : > { %p1335_p10 = pnand %p1333_p5, %p1597_p8  ;;  %p1341_p4 = scmp.lt.s32.totalorder %s1339_s16, %s1332_s9 }
  0x75   : > { %p1336_p9 = pneg %p1335_p10  ;;  %p1342_p0 = por %p1341_p4, %p1340_p3 }
  0x77   : > { %p1343_p11 = pnand %p1342_p0, %p1336_p9 }
  0x79   : > { %1346 = shalt.err (!%p1343_p11)
}
  0x7a   : > { %1177 = dma.hbm_to_vmem [thread:$0]  (!%p1580_p6), %s1672_s18, 256, %s1618_s28, %s1591_s25, %s1479_s1, %s1479_s1, %s1480_s5  }
  0x7b   : > { %p1905_p8 = scmp.ne.s32.totalorder %s1902_s19, 0 }
  0x7c   : > { %s1737_s27 = sand.u32 (!%p1905_p8), 1, %s1467_s30   ;;  %p1906_p13 = scmp.ne.s32.totalorder (!%p1905_p8), %s1897_s22, 0 }
  0x7d   : > { %360 = sbr.rel (%p1905_p8) target bundleno = 1216 (0x4c0), region = 44  ;;  %s1079_s14 = sshll.u32 (!%p1905_p8), %s1737_s27, 4 }
  0x7e   : > { %s363_s20 = scalar_lea.sflag (!%p1905_p8), [#allocation4], %s1737_s27  ;;  %s366_s23 = scalar_lea.vmem (!%p1905_p8), [#allocation3], %s1079_s14 }
  0x82   : > { %1442 = dma.done.wait (%p1906_p13), %s363_s20, 256  }
  0x83   : > { %1444 = vsyncadd (%p1906_p13), %s363_s20, 4294967040  ;;  %s371_s17 = sand.u32 1, %s1621_s11   ;;  %s1080_s25 = sshll.u32 %s1737_s27, 3 }
  0x84   : > { %s372_s28 = scalar_lea.sflag [#allocation7], %s371_s17  ;;  %s375_s18 = scalar_lea.vmem [#allocation6], %s1080_s25 }
  0x85   : > { %1446 = dma.done.wait (%p1906_p13), %s372_s28, 384  }
  0x86   : > { %1448 = vsyncadd (%p1906_p13), %s372_s28, 4294966912  ;;  %s384_s19 = scalar_lea.vmem [#allocation8], %s1079_s14  ;;  %p1907_p6 = scmp.eq.s32.totalorder %s1621_s11, 0 }
  0x88   : > { %1450 = dma.done.wait (%p1907_p6), [#allocation10], 512   ;;  %p1908_p12 = pmov %p1907_p6 }
  0x89   : > { %vm457_vm0 = vcmask 130048   ;;  %v450_v1 = vld [vmem:[%s384_s19 + $0x8] sm:$0xff]  ;;  %v449_v2 = vld [vmem:[%s384_s19] sm:$0xff]  ;;  %v446_v3 = vld [vmem:[%s366_s23] sm:$0xff]  ;;  %v1483_v5 = vmov 0.0   ;;  %vm1484_vm1 = vmmov 0  }
  0x8a   : > { %1452 = vsyncadd (%p1908_p12), [#allocation10], 4294966784  ;;  %1120 = vmatprep.subr.mxu0 %v450_v1  ;;  %1124 = vmatprep.mubr.msk.f32.mxu0 %vm457_vm0, %v446_v3  ;;  %v447_v4 = vld [vmem:[%s366_s23 + $0x8] sm:$0xff]  ;;  %s1485_s22 = smov 32   ;;  %vm543_vm2 = vcmask 261120   ;;  %v448_v9 = vld [vmem:[%s375_s18] sm:$0xff] }
  0x8b   : > { %1121 = vmatpush3.msra.mxu0 %v450_v1  ;;  %1132 = vmatprep.subr.mxu1 %v1483_v5  ;;  %vm551_vm3 = vcmask 64512   ;;  %v455_v11 = vld [vmem:[#allocation9 + $0x18] sm:$0xff]  ;;  %v454_v12 = vld [vmem:[#allocation9 + $0x10] sm:$0xff]  ;;  %v453_v13 = vld [vmem:[#allocation9 + $0x8] sm:$0xff]  ;;  %p443_p2 = scmp.lt.s32.totalorder %s1621_s11, 1  ;;  %vm626_vm4 = vcmask 523264  }
  0x8c   : > { %1122 = vmatprep.subr.mxu0 %v449_v2  ;;  %1140 = vmatprep.mubr.msk.f32.mxu1 %vm1484_vm1, %v1483_v5  ;;  %v452_v14 = vld [vmem:[#allocation9] sm:$0xff]  ;;  %s1774_s8 = scalar_lea.vmem [#allocation11], %s1080_s25  ;;  %vm826_vm5 = vcmask 253952   ;;  %s435_s29 = scalar_lea.vmem [#allocation12], %s1737_s27  ;;  %v1095_v32 = vld [vmem:[#allocation2] ss:$0 sm:$0xff] }
  0x8d   : > { %1123 = vmatpush3.msra.mxu0 %v449_v2  ;;  %1133 = vmatpush3.xpose.msk.msra.mxu1 %vm543_vm2, %v455_v11  ;;  %s444_s1 = scalar_select %p443_p2, %s1621_s11, 1  ;;  %v1486_v33 = vmov 0   ;;  %vm736_vm6 = vcmask 1040384  }
  0x8e   : > { %1125 = vmatmul.mubr.msk.f32.vlgmr.msra.gmra.mxu0 %vm457_vm0, %v447_v4  ;;  %1127 = vmatprep.subr.mxu0 %v1483_v5  ;;  %s1101_s12 = sshll.u32 %s1621_s11, 4  ;;  %s864_s21 = sshll.u32 %s435_s29, 4  ;;  %s865_s21 = int_to_ptr.vmem [resolvable:$true] %s864_s21 }
  0x8f   : > { %1129 = vmatprep.mubr.msk.f32.mxu0 %vm1484_vm1, %v1483_v5  ;;  %1134 = vmatprep.subr.mxu1 %v1483_v5  ;;  %s445_s6 = scalar_lea.vmem %s1864_s3, %s444_s1  ;;  %s862_s15 = scalar_lea.hbm %s1868_s7, %s1101_s12 }
  0x90   : > { %v1087_v15 = vld [vmem:[%s445_s6] ss:$0 sm:$0xff]  ;;  %1231 = vset.pattern.permute.xlu1 %v1486_v33  ;;  %1232 = vset.pattern.permute.xlu0 %v1486_v33  ;;  %s1790_s10 = scalar_lea.sflag [#allocation13], %s371_s17  ;;  %s1347_s16 = scalar_lea.vmem %s865_s21, 16 }
  0x91   : > { %1135 = vmatpush3.xpose.msk.msra.mxu1 %vm543_vm2, %v454_v12  ;;  %744 = vperm.xlu1 %1231, %v1095_v32   ;;  %p1348_p7 = scmp.ne.s32.totalorder %s865_s21, %s1347_s16  ;;  %p1909_p1 = scmp.ne.s32.totalorder %s1899_s24, 0 }
  0x92   : > { %1136 = vmatprep.subr.mxu1 %v1483_v5  ;;  %s1487_s14 = smov [#allocation12]  }
  0x93   : > { %p1349_p5 = pnand %p1348_p7, %p1909_p1  ;;  %s1351_s20 = sshll.u32 %s1487_s14, 4  ;;  %s1352_s20 = int_to_ptr.vmem [resolvable:$false] %s1351_s20 }
  0x94   : > { %s1353_s23 = scalar_lea.vmem %s1352_s20, 32  ;;  %p1354_p9 = scmp.lt.s32.totalorder %s865_s21, %s1352_s20 }
  0x95   : > { %1137 = vmatpush3.xpose.msk.msra.mxu1 %vm543_vm2, %v453_v13  ;;  %p1350_p10 = pneg %p1349_p5  ;;  %p1355_p3 = scmp.lt.s32.totalorder %s1353_s23, %s1347_s16 }
  0x96   : > { %1138 = vmatprep.subr.mxu1 %v1483_v5 }
  0x97   : > { %p1356_p4 = por %p1355_p3, %p1354_p9 }
  0x99   : > { %1139 = vmatpush3.xpose.msk.msra.mxu1 %vm543_vm2, %v452_v14  ;;  %p1357_p0 = pnand %p1356_p4, %p1350_p10 }
 0x14e   : > { %v1126_v6 = vpop.f32.mrf.mxu0 }
 0x14f   : > { %540 = vrot.lane.b32.xlu0 %v1126_v6, %s1485_s22 }
 0x150   : > { %v530_v7 = vpop.f32.mrf.mxu0 }
 0x1c1   : > { %v541_v8 = vpop.permute.xlu0 %540 }
 0x1c2   : > { %v544_v10 = vsel %vm543_vm2, %v530_v7, %v541_v8 }
 0x1c3   : > { %1128 = vmatpush3.msra.mxu0 %v544_v10 }
 0x1c4   : > { %1130 = vmatmul.mubr.msk.f32.vlgmr.msra.gmra.mxu0 %vm551_vm3, %v448_v9  ;;  %1143 = vmatprep.subr.mxu0 %v1483_v5 }
 0x1c5   : > { %1145 = vmatprep.mubr.msk.f32.mxu0 %vm1484_vm1, %v1483_v5 }
 0x284   : > { %v621_v16 = vpop.f32.mrf.mxu0 }
 0x285   : > { %v622_v17 = vadd.f32 %v1087_v15, %v621_v16 }
 0x286   : > { %v1131_v18 = vpop.f32.mrf.mxu0 }
 0x287   : > { %v625_v19 = vmax.f32 %v622_v17, 0.0 }
 0x289   : > { %v627_v20 = vsel %vm626_vm4, %v625_v19, 0.0  ;;  %1144 = vmatpush3.xpose.msk.msra.mxu0 %vm626_vm4, %v625_v19  ;;  %825 = vst.msk [vmem:[%s1774_s8] sm:$0xff] %vm626_vm4, %v625_v19 }
 0x28a   : > { %v628_v21 = vrot.slane %v627_v20, 4 }
 0x28c   : > { %v629_v22 = vadd.f32 %v628_v21, %v627_v20 }
 0x28e   : > { %v630_v23 = vrot.slane %v629_v22, 2 }
 0x290   : > { %v631_v24 = vadd.f32 %v630_v23, %v629_v22 }
 0x292   : > { %v632_v25 = vrot.slane %v631_v24, 1 }
 0x294   : > { %v633_v26 = vadd.f32 %v632_v25, %v631_v24 }
 0x296   : > { %v1089_v27 = vmul.f32 -0.125, %v633_v26 }
 0x298   : > { %v637_v28 = vmul.f32 1.442695, %v1089_v27 }
 0x29a   : > { %1233 = vpow2.f32 %v637_v28 }
 0x2a7   : > { %v1234_v29 = vpop.eup %1233 }
 0x2a8   : > { %v639_v30 = vadd.f32 1.0, %v1234_v29 }
 0x2aa   : > { %1235 = vrcp.f32 %v639_v30 }
 0x2b7   : > { %v1236_v31 = vpop.eup %1235 }
 0x2b8   : > { %1141 = vmatmul.mubr.msk.f32.vlgmr.msra.gmra.mxu1 %vm543_vm2, %v1236_v31  ;;  %827 = vst.msk [vmem:[%s435_s29] sm:$0x1] %vm826_vm5, %v1236_v31 }
 0x378   : > { %v723_v34 = vpop.f32.mrf.mxu1 }
 0x379   : > { %729 = vrot.lane.b32.xlu0 %v723_v34, %s1485_s22  ;;  %v727_v39 = vsel %vm543_vm2, %v723_v34, 0.0 }
 0x37a   : > { %v1142_v35 = vpop.f32.mrf.mxu1 }
 0x3eb   : > { %v730_v36 = vpop.permute.xlu0 %729 }
 0x3ec   : > { %v732_v37 = vsel %vm543_vm2, 0.0, %v730_v36 }
 0x3ed   : > { %v734_v38 = vrot.slane %v732_v37, 7 }
 0x3ef   : > { %v737_v40 = vsel %vm736_vm6, %v727_v39, %v734_v38 }
 0x3f0   : > { %1146 = vmatmul.mubr.msk.f32.vlgmr.msra.gmra.mxu0 %vm626_vm4, %v737_v40 }
 0x3f1   : > { %1360 = shalt.err (!%p1357_p0)
}
 0x3f2   : > { %s1361_s25 = scalar_lea.hbm %s862_s15, 16  ;;  %s1365_s18 = scalar_lea.hbm %s1868_s7, 32 }
 0x3f3   : > { %p1362_p11 = scmp.ne.s32.totalorder %s862_s15, %s1361_s25  ;;  %p1366_p6 = scmp.lt.s32.totalorder %s862_s15, %s1868_s7 }
 0x3f4   : > { %p1367_p12 = scmp.lt.s32.totalorder %s1365_s18, %s1361_s25 }
 0x3f5   : > { %p1363_p8 = pnand %p1362_p11, %p1909_p1 }
 0x3f6   : > { %p1368_p2 = por %p1367_p12, %p1366_p6 }
 0x3f7   : > { %p1364_p13 = pneg %p1363_p8 }
 0x3f9   : > { %p1369_p7 = pnand %p1368_p2, %p1364_p13 }
 0x3fb   : > { %1372 = shalt.err (!%p1369_p7)
}
 0x3fc   : > { %1159 = dma.vmem_to_hbm [thread:$0]  (%p1909_p1), %s865_s21, 16, %s862_s15, %s1790_s10  }
 0x3fd   : > { %s1100_s1 = sshll.u32 %s1621_s11, 7  ;;  %s851_s5 = sshll.u32 %s1774_s8, 4  ;;  %s852_s5 = int_to_ptr.vmem [resolvable:$true] %s851_s5 }
 0x3fe   : > { %s1910_s29 = sld [smem:[#allocation27_spill]]  ;;  %s829_s9 = scalar_lea.sflag [#allocation5], %s1737_s27 }
 0x3ff   : > { %s1373_s16 = scalar_lea.vmem %s852_s5, 128  ;;  %s1488_s14 = smov [#allocation11]  }
 0x400   : > { %p1374_p5 = scmp.ne.s32.totalorder %s852_s5, %s1373_s16  ;;  %s1377_s20 = sshll.u32 %s1488_s14, 4  ;;  %s1378_s20 = int_to_ptr.vmem [resolvable:$false] %s1377_s20 }
 0x401   : > { %s1379_s23 = scalar_lea.vmem %s1378_s20, 256  ;;  %p1380_p3 = scmp.lt.s32.totalorder %s852_s5, %s1378_s20 }
 0x402   : > { %p1375_p10 = pnand %p1374_p5, %p1909_p1  ;;  %p1381_p4 = scmp.lt.s32.totalorder %s1379_s23, %s1373_s16 }
 0x404   : > { %s1911_s12 = smov %s1910_s29  ;;  %s849_s26 = scalar_lea.hbm %s1910_s29, %s1100_s1 }
 0x405   : > { %p1376_p9 = pneg %p1375_p10  ;;  %p1382_p0 = por %p1381_p4, %p1380_p3 }
 0x407   : > { %p1383_p11 = pnand %p1382_p0, %p1376_p9 }
 0x409   : > { %1386 = shalt.err (!%p1383_p11)
}
 0x40a   : > { %s1387_s8 = scalar_lea.hbm %s849_s26, 128  ;;  %s1391_s25 = scalar_lea.hbm %s1911_s12, 256 }
 0x40b   : > { %p1388_p8 = scmp.ne.s32.totalorder %s849_s26, %s1387_s8  ;;  %p1392_p12 = scmp.lt.s32.totalorder %s849_s26, %s1911_s12 }
 0x40c   : > { %p1393_p2 = scmp.lt.s32.totalorder %s1391_s25, %s1387_s8 }
 0x40d   : > { %p1389_p13 = pnand %p1388_p8, %p1909_p1 }
 0x40e   : > { %p1394_p7 = por %p1393_p2, %p1392_p12 }
 0x40f   : > { %p1390_p6 = pneg %p1389_p13 }
 0x411   : > { %p1395_p5 = pnand %p1394_p7, %p1390_p6 }
 0x413   : > { %1398 = shalt.err (!%p1395_p5)
}
 0x414   : > { %1158 = dma.vmem_to_hbm [thread:$0]  (%p1909_p1), %s852_s5, 128, %s849_s26, %s829_s9   ;;  %v745_v41 = vpop.permute.xlu1 %744  ;;  %vm823_vm7 = vcmask 58368  }
 0x415   : > { %s1084_s18 = sshll.u32 %s1737_s27, 1  ;;  %s1102_s19 = sshll.u32 %s1621_s11, 5 }
 0x416   : > { %s442_s22 = scalar_lea.vmem [#allocation14], %s1084_s18  ;;  %s1912_s29 = sld [smem:[#allocation28_spill]] }
 0x417   : > { %s877_s1 = sshll.u32 %s442_s22, 4  ;;  %s1489_s27 = smov [#allocation14]   ;;  %s878_s1 = int_to_ptr.vmem [resolvable:$true] %s877_s1 }
 0x418   : > { %s1399_s20 = scalar_lea.vmem %s878_s1, 32  ;;  %s1403_s5 = sshll.u32 %s1489_s27, 4  ;;  %s1404_s5 = int_to_ptr.vmem [resolvable:$false] %s1403_s5 }
 0x419   : > { %p1400_p10 = scmp.ne.s32.totalorder %s878_s1, %s1399_s20  ;;  %s1405_s11 = scalar_lea.vmem %s1404_s5, 64 }
 0x41a   : > { %p1406_p4 = scmp.lt.s32.totalorder %s878_s1, %s1404_s5  ;;  %p1407_p0 = scmp.lt.s32.totalorder %s1405_s11, %s1399_s20 }
 0x41b   : > { %p1401_p9 = pnand %p1400_p10, %p1909_p1 }
 0x41c   : > { %s1913_s16 = smov %s1912_s29  ;;  %s875_s14 = scalar_lea.hbm %s1912_s29, %s1102_s19 }
 0x41d   : > { %p1402_p3 = pneg %p1401_p9  ;;  %p1408_p11 = por %p1407_p0, %p1406_p4 }
 0x41f   : > { %p1409_p8 = pnand %p1408_p11, %p1402_p3 }
 0x4b0   : > { %v819_v42 = vpop.f32.mrf.mxu0 }
 0x4b1   : > { %v820_v43 = vadd.f32 %v819_v42, %v745_v41 }
 0x4b2   : > { %v1147_v44 = vpop.f32.mrf.mxu0 }
 0x4b3   : > { %824 = vst.msk [vmem:[%s442_s22] sm:$0x3] %vm823_vm7, %v820_v43 }
 0x4b4   : > { %1412 = shalt.err (!%p1409_p8)
}
 0x4b5   : > { %s1413_s26 = scalar_lea.hbm %s875_s14, 32  ;;  %s1417_s8 = scalar_lea.hbm %s1913_s16, 64 }
 0x4b6   : > { %p1414_p13 = scmp.ne.s32.totalorder %s875_s14, %s1413_s26  ;;  %p1418_p2 = scmp.lt.s32.totalorder %s875_s14, %s1913_s16 }
 0x4b7   : > { %p1419_p7 = scmp.lt.s32.totalorder %s1417_s8, %s1413_s26 }
 0x4b8   : > { %p1415_p6 = pnand %p1414_p13, %p1909_p1 }
 0x4b9   : > { %p1420_p5 = por %p1419_p7, %p1418_p2 }
 0x4ba   : > { %p1416_p12 = pneg %p1415_p6 }
 0x4bc   : > { %p1421_p10 = pnand %p1420_p5, %p1416_p12 }
 0x4be   : > { %1424 = shalt.err (!%p1421_p10)
}
 0x4bf   : > { %1160 = dma.vmem_to_hbm [thread:$0]  (%p1909_p1), %s878_s1, 32, %s875_s14, %s1790_s10  }
 0x4c0 PF: > { %s1914_s25 = sld [smem:[#allocation20_spill]] }
 0x4c1   : > { %s1915_s17 = sld [smem:[#allocation25_spill]] }
 0x4c2   : > { %s1916_s28 = sld [smem:[#allocation22_spill]] }
 0x4c6   : > { %s889_s18 = sand.u32 1, %s1914_s25  }
 0x4c7   : > { %p1917_p9 = scmp.ne.s32.totalorder %s1915_s17, 0  ;;  %s890_s19 = scalar_lea.sflag [#allocation5], %s889_s18 }
 0x4c8   : > { %p1918_p3 = scmp.ge.s32.totalorder %s1916_s28, 2 }
 0x4ca   : > { %p1179_p4 = pnand %p1918_p3, %p1917_p9 }
 0x4cc   : > { %p1180_p0 = pneg %p1179_p4 }
 0x4ce   : > { %1454 = dma.done.wait (%p1180_p0), %s890_s19, 128  }
 0x4cf   : > { %1456 = vsyncadd (%p1180_p0), %s890_s19, 4294967168  ;;  %s1919_s22 = sadd.s32 4294967294, %s1916_s28  }
 0x4d0   : > { %s898_s13 = sand.u32 1, %s1919_s22  }
 0x4d1   : > { %s899_s6 = scalar_lea.sflag [#allocation13], %s898_s13 }
 0x4d2   : > { %1458 = dma.done.wait (%p1180_p0), %s899_s6, 48  }
 0x4d3   : > { %1460 = vsyncadd (%p1180_p0), %s899_s6, 4294967248  ;;  %s1920_s10 = sld [smem:[#allocation23_spill]]  ;;  %s1923_s29 = smov %s1467_s30 }
 0x4d4   : > { %s1921_s24 = sld [smem:[#allocation21_spill]] }
 0x4d5   : > { %s1922_s9 = sld [smem:[#allocation24_spill]] }
 0x4d9   : > { %p31_p1 = scmp.ge.s32.totalorder %s1920_s10, 4  }
 0x4da   : > { %s1924_s30 = smov %s1921_s24 }
 0x4db   :  { %33 = sbr.rel (!%p31_p1) target bundleno = 14 (0xe), region = 152 }
 0x4e0   :  { %912 = vsyncpa [#allocation4], 1 }
 0x4e1   :  { %914 = vsyncpa [#allocation4 + $0x1], 1 }
 0x4e2   :  { %915 = vsyncpa [#allocation7], 1 }
 0x4e3   :  { %917 = vsyncpa [#allocation7 + $0x1], 1 }
 0x4e4   :  { %918 = vsyncpa [#allocation10], 1 }
 0x4e5   :  { %919 = vsyncpa [#allocation5], 1 }
 0x4e6   :  { %921 = vsyncpa [#allocation5 + $0x1], 1 }
 0x4e7   :  { %922 = vsyncpa [#allocation13], 1 }
 0x4e8   :  { %924 = vsyncpa [#allocation13 + $0x1], 1 }

</bundles_post_ra>
